<compile_context>
chip_gen: v7x
topology: tpu7x:2x2x1
jax: 0.10.0
libtpu: 0.0.40
codegen_flags: <defaults>
</compile_context>

<pallas_src>
import jax
import jax.numpy as jnp
from jax.experimental import pallas as pl
from jax.experimental.pallas import tpu as pltpu


def _cconv1x1_interleaved_kernel(x_ref, wr_ref, wi_ref, y_ref):
    """One spatial tile of the complex 1x1 conv on interleaved real/imag lanes.

    x_ref : (Cin,  L) f32, lanes = [re0, im0, re1, im1, ...]
    wr_ref: (Cout, Cin) f32   (real part of the block-triangular weight)
    wi_ref: (Cout, Cin) f32   (imag part)
    y_ref : (Cout, L) f32, same interleaved lane layout as x.
    """
    x = x_ref[...]
    l = x.shape[-1]
    # Lane-pair swap with sign: x_alt[:, 2s] = -x[:, 2s+1] ; x_alt[:, 2s+1] = x[:, 2s].
    # pltpu.roll follows jnp.roll semantics: roll(x, s)[j] = x[(j - s) % l].
    x_next = pltpu.roll(x, shift=l - 1, axis=1)      # x_next[:, j] = x[:, (j + 1) % l]
    x_prev = pltpu.roll(x, shift=1, axis=1)          # x_prev[:, j] = x[:, (j - 1) % l]
    lane = jax.lax.broadcasted_iota(jnp.int32, x.shape, dimension=1)
    is_even = (lane & 1) == 0
    x_alt = jnp.where(is_even, -x_next, x_prev)
    # Two K=Cin MXU dots + one VPU add (all hidden under the HBM-bound DMA).
    y_ref[...] = (
        jnp.dot(wr_ref[...], x, preferred_element_type=jnp.float32)
        + jnp.dot(wi_ref[...], x_alt, preferred_element_type=jnp.float32)
    )


def complex_conv2d_1x1(x, w_full, *, max_lane_tile=32768,
                       vmem_budget_bytes=8 << 20,
                       vmem_limit_bytes=32 << 20):
    """Complex 1x1 conv2d.

    x: float32 (B, Cin, H, W, 2) real view (interleaved re/im, torch.view_as_real layout)
       -- the zero-extra-copy fast path -- or complex64 (B, Cin, H, W) (fallback adds one
       HBM pass to build the interleaved view).
    w_full: complex (Cout, Cin, 1, 1).
    Returns float32 (B, Cout, H, W, 2): the real view of the complex output.
    """
    if jnp.iscomplexobj(x):
        # Fallback path: materialize the interleaved real view (one extra HBM pass).
        B, Cin, H, W = x.shape
        xv = jnp.stack([jnp.real(x), jnp.imag(x)], axis=-1).astype(jnp.float32)
    else:
        assert x.ndim == 5 and x.shape[-1] == 2, "expected real view (..., 2)"
        B, Cin, H, W, _ = x.shape
        xv = x.astype(jnp.float32)

    Cout = w_full.shape[0]
    assert w_full.shape == (Cout, Cin, 1, 1)
    w2d = w_full[:, :, 0, 0]
    wr = jnp.real(w2d).astype(jnp.float32)
    wi = jnp.imag(w2d).astype(jnp.float32)

    S = H * W
    L_total = 2 * S                                    # interleaved lane extent
    x2 = xv.reshape(B, Cin, L_total)                   # free reshape (contiguous)

    # Lane tile: multiple of 256 (=128 pixels), sized from a double-buffered VMEM
    # budget, capped; the ragged trailing block (if any) is handled by Pallas.
    if L_total <= 256:
        lt = L_total
    else:
        bytes_per_lane = 2 * 4 * (Cin + Cout)          # dbl-buffered f32 in + out
        lt = max(256, min(max_lane_tile, vmem_budget_bytes // bytes_per_lane))
        lt = (lt // 256) * 256
        if lt >= L_total:
            lt = L_total                               # single full-extent block
    grid = (B, pl.cdiv(L_total, lt))

    x_spec = pl.BlockSpec((None, Cin, lt), lambda b, s: (b, 0, s))
    w_spec = pl.BlockSpec((Cout, Cin), lambda b, s: (0, 0))
    y_spec = pl.BlockSpec((None, Cout, lt), lambda b, s: (b, 0, s))

    cost = pl.CostEstimate(
        flops=8 * B * S * Cin * Cout,
        transcendentals=0,
        bytes_accessed=4 * B * L_total * (Cin + Cout) + 2 * 4 * Cout * Cin,
    )

    y2 = pl.pallas_call(
        _cconv1x1_interleaved_kernel,
        out_shape=jax.ShapeDtypeStruct((B, Cout, L_total), jnp.float32),
        grid_spec=pltpu.PrefetchScalarGridSpec(
            num_scalar_prefetch=0,
            grid=grid,
            in_specs=[x_spec, w_spec, w_spec],
            out_specs=y_spec,
        ),
        compiler_params=pltpu.CompilerParams(
            dimension_semantics=("parallel", "parallel"),
            vmem_limit_bytes=vmem_limit_bytes,
        ),
        cost_estimate=cost,
    )(x2, wr, wi)

    # Output is already channel-major interleaved re/im: a free reshape gives the
    # real view of the complex NCHW result (no slicing / recombine passes).
    return y2.reshape(B, Cout, H, W, 2)


def build_triangular_weights(key, group_in, group_out):
    """Synthetic init of the block lower-triangular complex weight, mirroring
    TriangularComplexConv2d.full_weights(): each group's sub-weight has
    in_channels = cumulative input channels and is zero-padded to total_in.

    Returns complex64 (total_out, total_in, 1, 1)."""
    total_in = sum(group_in.values())
    blocks = []
    cum_in = 0
    for gname in group_in:
        cum_in += group_in[gname]
        out_k = group_out[gname]
        key, kr, ki = jax.random.split(key, 3)
        # TODO(synk): the original module uses unitary_init for complex weights; a plain
        # deterministic Gaussian init is used here (synthetic parameters, same math).
        wre = jax.random.normal(kr, (out_k, cum_in), jnp.float32) / jnp.sqrt(cum_in)
        wim = jax.random.normal(ki, (out_k, cum_in), jnp.float32) / jnp.sqrt(cum_in)
        w_sub = (wre + 1j * wim).astype(jnp.complex64)
        w_pad = jnp.pad(w_sub, ((0, 0), (0, total_in - cum_in)))   # upper block = 0
        blocks.append(w_pad)
    return jnp.concatenate(blocks, axis=0)[:, :, None, None]


def triangular_complex_conv2d(x, w_full, group_out):
    """Forward of TriangularComplexConv2d: full block-triangular conv, then split the
    output channels per group (SplitTensor equivalent).  Returns (full y, dict)."""
    y = complex_conv2d_1x1(x, w_full)
    out, start = {}, 0
    for gname, c in group_out.items():
        out[gname] = y[:, start:start + c]
        start += c
    return y, out


if __name__ == "__main__":
    # Small config consistent with the module: two groups, 1x1 kernel, complex data.
    B, H, W = 2, 16, 16
    group_in = {"a": 2, "b": 2}          # total_in_channels = 4
    group_out = {"a": 3, "b": 5}         # total_out_channels = 8
    Cin = sum(group_in.values())
    Cout = sum(group_out.values())

    root = jax.random.PRNGKey(0)
    kx, kw = jax.random.split(root)
    # Interleaved real view of the complex input (torch.view_as_real layout):
    # this is the zero-copy fast path into the kernel.
    x_view = jax.random.normal(kx, (B, Cin, H, W, 2), jnp.float32)

    w_full = build_triangular_weights(kw, group_in, group_out)

    y_view, y_split = triangular_complex_conv2d(x_view, w_full, group_out)
    y_view = jax.block_until_ready(y_view)

    # Correctness check vs. plain-JAX complex 1x1 conv at highest precision.
    x_c = (x_view[..., 0] + 1j * x_view[..., 1]).astype(jnp.complex64)
    y_ref = jnp.einsum("kc,bchw->bkhw", w_full[:, :, 0, 0], x_c,
                       precision=jax.lax.Precision.HIGHEST)

    assert y_view.shape == (B, Cout, H, W, 2) and y_view.dtype == jnp.float32
    # The MXU f32 matmul may use reduced (bf16-multiply) precision at default settings;
    # tolerance covers that while still catching any layout / sign / pairing error.
    assert jnp.allclose(y_view[..., 0], jnp.real(y_ref), atol=2e-2, rtol=2e-2)
    assert jnp.allclose(y_view[..., 1], jnp.imag(y_ref), atol=2e-2, rtol=2e-2)
    assert y_split["a"].shape == (B, group_out["a"], H, W, 2)
    assert y_split["b"].shape == (B, group_out["b"], H, W, 2)

    print("KERNEL_OK")
</pallas_src>

<mosaic_0001>
module attributes {stable_mosaic.version = 11 : i64} {
  func.func @_cconv1x1_interleaved_kernel(%arg0: i32, %arg1: i32, %arg2: memref<1x4x512xf32, #tpu.memory_space<vmem>>, %arg3: memref<8x4xf32, #tpu.memory_space<vmem>>, %arg4: memref<8x4xf32, #tpu.memory_space<vmem>>, %arg5: memref<1x8x512xf32, #tpu.memory_space<vmem>>) attributes {dimension_semantics = [#tpu.dimension_semantics<parallel>, #tpu.dimension_semantics<parallel>], iteration_bounds = array<i64: 2, 1>, scalar_prefetch = 0 : i64, scratch_operands = 0 : i64, tpu.core_type = #tpu.core_type<tc>, window_params = [{transform_indices = @transform_0, window_bounds = array<i64: 1, 4, 512>}, {pipeline_mode = #tpu.pipeline_mode<synchronous>, transform_indices = @transform_1, window_bounds = array<i64: 8, 4>}, {pipeline_mode = #tpu.pipeline_mode<synchronous>, transform_indices = @transform_2, window_bounds = array<i64: 8, 4>}, {transform_indices = @transform_3, window_bounds = array<i64: 1, 8, 512>}]} {
    %c0 = arith.constant 0 : index
    %c0_0 = arith.constant 0 : index
    %c0_1 = arith.constant 0 : index
    %0 = vector.load %arg2[%c0, %c0_0, %c0_1] : memref<1x4x512xf32, #tpu.memory_space<vmem>>, vector<1x4x512xf32>
    %1 = vector.shape_cast %0 : vector<1x4x512xf32> to vector<4x512xf32>
    %c511_i32 = arith.constant 511 : i32
    %2 = tpu.dynamic_rotate %1 by %c511_i32 dim 1 : vector<4x512xf32>, i32 -> vector<4x512xf32>
    %c1_i32 = arith.constant 1 : i32
    %3 = tpu.dynamic_rotate %1 by %c1_i32 dim 1 : vector<4x512xf32>, i32 -> vector<4x512xf32>
    %4 = tpu.iota {dimensions = array<i32: 1>} : vector<4x512xi32>
    %c1_i32_2 = arith.constant 1 : i32
    %5 = vector.broadcast %c1_i32_2 : i32 to vector<4x512xi32>
    %6 = arith.andi %4, %5 : vector<4x512xi32>
    %c0_i32 = arith.constant 0 : i32
    %7 = vector.broadcast %c0_i32 : i32 to vector<4x512xi32>
    %8 = arith.cmpi eq, %6, %7 : vector<4x512xi32>
    %cst = arith.constant 0.000000e+00 : f32
    %9 = vector.broadcast %cst : f32 to vector<4x512xf32>
    %10 = arith.subf %9, %2 : vector<4x512xf32>
    %11 = arith.select %8, %10, %3 : vector<4x512xi1>, vector<4x512xf32>
    %c0_3 = arith.constant 0 : index
    %c0_4 = arith.constant 0 : index
    %12 = vector.load %arg3[%c0_3, %c0_4] : memref<8x4xf32, #tpu.memory_space<vmem>>, vector<8x4xf32>
    %cst_5 = arith.constant dense<0.000000e+00> : vector<8x512xf32>
    %13 = tpu.matmul %12, %1, %cst_5 {dimension_numbers = #tpu.dot_dimension_numbers<[1], [0], [0], [1], [0, 0, 1, 1], [], []>} : vector<8x4xf32>, vector<4x512xf32>, vector<8x512xf32> -> vector<8x512xf32>
    %c0_6 = arith.constant 0 : index
    %c0_7 = arith.constant 0 : index
    %14 = vector.load %arg4[%c0_6, %c0_7] : memref<8x4xf32, #tpu.memory_space<vmem>>, vector<8x4xf32>
    %cst_8 = arith.constant dense<0.000000e+00> : vector<8x512xf32>
    %15 = tpu.matmul %14, %11, %cst_8 {dimension_numbers = #tpu.dot_dimension_numbers<[1], [0], [0], [1], [0, 0, 1, 1], [], []>} : vector<8x4xf32>, vector<4x512xf32>, vector<8x512xf32> -> vector<8x512xf32>
    %16 = arith.addf %13, %15 : vector<8x512xf32>
    %c0_9 = arith.constant 0 : index
    %c0_10 = arith.constant 0 : index
    %c0_11 = arith.constant 0 : index
    %17 = vector.load %arg5[%c0_9, %c0_10, %c0_11] : memref<1x8x512xf32, #tpu.memory_space<vmem>>, vector<1x8x512xf32>
    %18 = vector.shape_cast %17 : vector<1x8x512xf32> to vector<8x512xf32>
    %19 = vector.shape_cast %16 : vector<8x512xf32> to vector<1x8x512xf32>
    tpu.vector_store %arg5[%c0_9, %c0_10, %c0_11], %19 {strides = array<i32>} : memref<1x8x512xf32, #tpu.memory_space<vmem>>, vector<1x8x512xf32>,
    return
  }
  func.func @transform_0(%arg0: i32, %arg1: i32) -> (i32, i32, i32) {
    %c0_i32 = arith.constant 0 : i32
    %c0_i32_0 = arith.constant 0 : i32
    return %arg0, %c0_i32, %arg1 : i32, i32, i32
  }
  func.func @transform_1(%arg0: i32, %arg1: i32) -> (i32, i32) {
    %c0_i32 = arith.constant 0 : i32
    %c0_i32_0 = arith.constant 0 : i32
    %c0_i32_1 = arith.constant 0 : i32
    return %c0_i32, %c0_i32_0 : i32, i32
  }
  func.func @transform_2(%arg0: i32, %arg1: i32) -> (i32, i32) {
    %c0_i32 = arith.constant 0 : i32
    %c0_i32_0 = arith.constant 0 : i32
    %c0_i32_1 = arith.constant 0 : i32
    return %c0_i32, %c0_i32_0 : i32, i32
  }
  func.func @transform_3(%arg0: i32, %arg1: i32) -> (i32, i32, i32) {
    %c0_i32 = arith.constant 0 : i32
    %c0_i32_0 = arith.constant 0 : i32
    return %arg0, %c0_i32, %arg1 : i32, i32, i32
  }
}

</mosaic_0001>

<bundles_post_ra>
// kernel: tpu_custom_call.1
= control target key start
LH: loop header
LB: loop body
LE: loop exit
PB: predicated region body
PF: predicated region fallthrough
CT: control target
= control target key end

     0   :  { %8 = vsyncpa [#allocation3], 0  ;;  %s1139_s0 = inlined_call_operand.hbm [shape: f32[2,4,512], index: 0, kind: input, shape index: {}]   ;;  %s1140_s1 = inlined_call_operand.vmem [shape: f32[8,4], index: 1, kind: input, shape index: {}]   ;;  %s1141_s2 = inlined_call_operand.vmem [shape: f32[8,4], index: 2, kind: input, shape index: {}]   ;;  %s1142_s3 = inlined_call_operand.hbm [shape: f32[2,8,512], index: 3, kind: output, shape index: {}]  }
   0x1   :  { %10 = vsyncpa [#allocation3 + $0x1], 0 }
   0x2   :  { %11 = vsyncpa [#allocation4], 0 }
   0x3   :  { %13 = vsyncpa [#allocation4 + $0x1], 0  ;;  %s920_s12 = smov 0   ;;  %s922_s13 = smov 0  }
   0x4   :  { %s924_s14 = smov 0   ;;  %s926_s15 = smov 0  }
   0x5   :  { %s928_s16 = smov 0   ;;  %s930_s17 = smov 0  }
   0x6 LB: > { %s681_s18 = sadd.s32 4294967295, %s893_s17   ;;  %s682_s19 = sadd.s32 4294967294, %s893_s17   ;;  %s893_s17 = sphi %s930_s17, %s19_s17   ;;  %s889_s16 = sphi %s928_s16, %s1160_s16   ;;  %s885_s15 = sphi %s926_s15, %s1159_s15   ;;  %s881_s14 = sphi %s924_s14, %s1158_s14   ;;  %s877_s13 = sphi %s922_s13, %s1157_s13   ;;  %s873_s12 = sphi %s920_s12, %s1156_s12  }
   0x7   : > { %s31_s20 = sadd.s32 1, %s889_s16  ;;  %s40_s21 = sadd.s32 1, %s881_s14 }
   0x8   : > { %p33_p0 = scmp.ge.s32.totalorder %s31_s20, 2  ;;  %p47_p1 = scmp.ne.s32.totalorder %s881_s14, %s877_s13 }
   0x9   : > { %p48_p2 = scmp.eq.s32.totalorder %s893_s17, 0  ;;  %p53_p3 = scmp.ne.s32.totalorder %s877_s13, %s873_s12 }
   0xa   : > { %s1162_s20 = smov (%p33_p0, %s31_s20), 0  ;;  %p54_p5 = scmp.eq.s32.totalorder %s681_s18, 0 }
   0xb   : > { %p961_p4 = por %p48_p2, %p47_p1  ;;  %s35_s23 = ssub.s32 %s889_s16, %s1162_s20 }
   0xc   : > { %p121_p6 = scmp.eq.s32.totalorder %s681_s18, 1  ;;  %p38_p7 = scmp.eq.s32.totalorder %s35_s23, 0 }
   0xd   : > { %p967_p8 = por %p54_p5, %p53_p3  ;;  %p127_p10 = scmp.eq.s32.totalorder %s682_s19, 1 }
   0xe   : > { %p971_p9 = por %p121_p6, %p47_p1  ;;  %p726_p13 = scmp.lt.s32.totalorder %s893_s17, 2 }
   0xf   : > { %s976_s26 = scalar_select %p38_p7, %s881_s14, %s40_s21  }
  0x10   : > { %s1146_s25 = scalar_select %p971_p9, 1, 0 }
  0x11   : > { %p978_p11 = por %p127_p10, %p53_p3  ;;  %s153_s28 = sand.u32 1, %s881_s14  }
  0x12   : > { %s685_s29 = sshll.u32 %s153_s28, 4  ;;  %s708_s30 = sshll.u32 %s889_s16, 8 }
  0x13   : > { %s1147_s27 = scalar_select %p978_p11, 1, 0 }
  0x14   : > { %s989_s6 = scalar_lea.hbm %s1139_s0, %s708_s30  ;;  %s157_s7 = scalar_lea.vmem [#allocation2], %s685_s29 }
  0x15   : > { %s167_s8 = sshll.u32 %s157_s7, 4  ;;  %p995_p0 = pnand %p726_p13, %p961_p4  ;;  %s991_s8 = int_to_ptr.vmem [resolvable:$true] %s167_s8 }
  0x16   : > { %s154_s10 = scalar_lea.sflag [#allocation3], %s153_s28  ;;  %s781_s11 = scalar_lea.hbm %s989_s6, 256 }
  0x17   : > { %p782_p3 = scmp.ne.s32.totalorder %s989_s6, %s781_s11  ;;  %p783_p5 = pneg %p995_p0 }
  0x18   : > { %s786_s21 = scalar_lea.hbm %s1139_s0, 512  ;;  %p787_p4 = scmp.lt.u32.totalorder %s989_s6, %s1139_s0 }
  0x19   : > { %p784_p6 = pnand %p783_p5, %p782_p3  ;;  %p788_p10 = scmp.lt.u32.totalorder %s786_s21, %s781_s11 }
  0x1a   : > { %p790_p12 = scmp.lt.u32.totalorder %s781_s11, %s989_s6 }
  0x1b   : > { %p785_p7 = pneg %p784_p6  ;;  %p789_p13 = por %p788_p10, %p787_p4 }
  0x1d   : > { %p791_p1 = por %p790_p12, %p789_p13 }
  0x1f   : > { %p792_p2 = pnand %p791_p1, %p785_p7 }
  0x21   : > { %795 = shalt.err (!%p792_p2)
}
  0x22   : > { %s796_s28 = scalar_lea.vmem %s991_s8, 256  ;;  %s895_s29 = smov [#allocation2]  }
  0x23   : > { %p797_p3 = scmp.ne.s32.totalorder %s991_s8, %s796_s28  ;;  %s801_s30 = sshll.u32 %s895_s29, 4  ;;  %s802_s30 = int_to_ptr.vmem [resolvable:$false] %s801_s30 }
  0x24   : > { %s803_s4 = scalar_lea.vmem %s802_s30, 512  ;;  %p804_p9 = scmp.lt.s32.totalorder %s991_s8, %s802_s30 }
  0x25   : > { %p799_p6 = pnand %p797_p3, %p783_p5  ;;  %p805_p4 = scmp.lt.s32.totalorder %s803_s4, %s796_s28 }
  0x27   : > { %p800_p11 = pneg %p799_p6  ;;  %p806_p10 = por %p805_p4, %p804_p9 }
  0x29   : > { %p807_p12 = pnand %p806_p10, %p800_p11 }
  0x2b   : > { %810 = shalt.err (!%p807_p12)
}
  0x2c   : > { %721 = dma.hbm_to_vmem [thread:$0]  (!%p995_p0), %s989_s6, 256, %s991_s8, %s154_s10  }
  0x2d   : > { %p1149_p1 = scmp.lt.s32.totalorder %s893_s17, 3  ;;  %p1150_p2 = scmp.ge.s32.totalorder %s893_s17, 1 }
  0x2f   : > { %p173_p5 = pnand %p1150_p2, %p1149_p1 }
  0x30   : > { %s1031_s5 = sand.u32 (!%p173_p5), 1, %s877_s13  }
  0x31   : > { %176 = sbr.rel (%p173_p5) target bundleno = 424 (0x1a8), region = 32  ;;  %s689_s7 = sshll.u32 (!%p173_p5), %s1031_s5, 4 }
  0x32   : > { %s179_s11 = scalar_lea.sflag (!%p173_p5), [#allocation3], %s1031_s5  ;;  %s182_s18 = scalar_lea.vmem (!%p173_p5), [#allocation2], %s689_s7 }
  0x38   : > { %864 = dma.done.wait (%p967_p8), %s179_s11, 256  }
  0x39   : > { %866 = vsyncadd (%p967_p8), %s179_s11, 4294967040  ;;  %v1039_v0 = vld [vmem:[%s182_s18 + $0x8] sm:$0xff]  ;;  %v1041_v1 = vld [vmem:[%s182_s18] sm:$0xff]  ;;  %s896_s6 = smov 127   ;;  %v897_v3 = vmov 0.0   ;;  %s898_s24 = smov 1   ;;  %v223_v5 = vlaneseq }
  0x3a   : > { %219 = vrot.lane.b32.xlu1 %v1039_v0, %s896_s6  ;;  %215 = vrot.lane.b32.xlu0 %v1041_v1, %s896_s6  ;;  %v212_v2 = vcombine.high %v1039_v0, %v1039_v0  ;;  %v211_v4 = vcombine.high %v1041_v1, %v1041_v1  ;;  %vm268_vm3 = vcmask 1043456   ;;  %v263_v36 = vld [vmem:[%s1141_s2] sm:$0xff]  ;;  %vm264_vm7 = vcmask 31744   ;;  %s690_s21 = sshll.u32 %s1031_s5, 5  ;;  %s709_s28 = sshll.u32 %s885_s15, 9 }
  0x3b   : > { %345 = vmatprep.mubr.f32.mxu0 %v897_v3  ;;  %416 = vmatprep.mubr.f32.mxu1 %v897_v3  ;;  %v224_v6 = vand.u32 127, %v223_v5  ;;  %v262_v40 = vld [vmem:[%s1140_s1] sm:$0xff]  ;;  %s204_s22 = scalar_lea.vmem [#allocation5], %s690_s21  ;;  %s1092_s4 = scalar_lea.hbm %s1142_s3, %s709_s28 }
  0x3c   : > { %s597_s23 = sshll.u32 %s204_s22, 4  ;;  %s581_s7 = scalar_lea.sflag [#allocation4], %s1031_s5  ;;  %s1087_s23 = int_to_ptr.vmem [resolvable:$true] %s597_s23 }
  0x3d   : > { %v243_v9 = vadd.s32 128, %v224_v6  ;;  %v245_v10 = vadd.s32 384, %v224_v6  ;;  %v244_v11 = vadd.s32 256, %v224_v6  ;;  %vm225_vm0 = vcmp.lt.s32.totalorder %v224_v6, 127  ;;  %s811_s15 = scalar_lea.vmem %s1087_s23, 512  ;;  %p1153_p9 = scmp.ne.s32.totalorder %s1146_s25, 0 }
  0x3e   : > { %221 = vrot.lane.b32.xlu1 %v212_v2, %s896_s6  ;;  %230 = vrot.lane.b32.xlu0 %v1041_v1, %s898_s24  ;;  %v246_v15 = vand.u32 1, %v224_v6  ;;  %vm238_vm1 = vcmp.lt.s32.totalorder %v224_v6, 1  ;;  %p812_p8 = scmp.ne.s32.totalorder %s1087_s23, %s811_s15  ;;  %s899_s11 = smov [#allocation5]  }
  0x3f   : > { %v247_v14 = vand.u32 1, %v243_v9  ;;  %v249_v16 = vand.u32 1, %v245_v10  ;;  %v248_v17 = vand.u32 1, %v244_v11  ;;  %s815_s18 = sshll.u32 %s899_s11, 4  ;;  %s816_s18 = int_to_ptr.vmem [resolvable:$false] %s815_s18 }
  0x40   : > { %vm250_vm4 = vcmp.eq.s32.totalorder %v246_v15, 0  ;;  %p813_p11 = pnand %p812_p8, %p1153_p9  ;;  %p818_p7 = scmp.lt.s32.totalorder %s1087_s23, %s816_s18 }
  0x41   : > { %vm1053_vm2 = vcmp.eq.s32.totalorder %v247_v14, 0  ;;  %vm253_vm5 = vcmp.eq.s32.totalorder %v249_v16, 0  ;;  %vm252_vm6 = vcmp.eq.s32.totalorder %v248_v17, 0 }
  0x42   : > { %232 = vrot.lane.b32.xlu1 %v211_v4, %s898_s24  ;;  %217 = vrot.lane.b32.xlu0 %v211_v4, %s896_s6  ;;  %p814_p0 = pneg %p813_p11  ;;  %s817_s6 = scalar_lea.vmem %s816_s18, 1024 }
  0x43   : > { %p819_p13 = scmp.lt.s32.totalorder %s817_s6, %s811_s15 }
  0x45   : > { %p820_p3 = por %p819_p13, %p818_p7 }
  0x46   : > { %236 = vrot.lane.b32.xlu1 %v212_v2, %s898_s24  ;;  %234 = vrot.lane.b32.xlu0 %v1039_v0, %s898_s24 }
  0x47   : > { %p821_p6 = pnand %p820_p3, %p814_p0 }
  0xac   : > { %v220_v7 = vpop.permute.xlu1 %219  ;;  %v216_v8 = vpop.permute.xlu0 %215 }
  0xb0   : > { %v222_v12 = vpop.permute.xlu1 %221  ;;  %v231_v13 = vpop.permute.xlu0 %230 }
  0xb1   : > { %v226_v21 = vsel %vm225_vm0, %v220_v7, %v222_v12  ;;  %v229_v22 = vsel %vm225_vm0, %v222_v12, %v216_v8 }
  0xb2   : > { %v256_v27 = vsub.f32 0.0, %v226_v21  ;;  %v257_v28 = vsub.f32 0.0, %v229_v22 }
  0xb4   : > { %v233_v18 = vpop.permute.xlu1 %232  ;;  %v218_v19 = vpop.permute.xlu0 %217 }
  0xb5   : > { %v227_v23 = vsel %vm225_vm0, %v218_v19, %v220_v7  ;;  %v228_v24 = vsel %vm225_vm0, %v216_v8, %v218_v19  ;;  %v241_v26 = vsel %vm238_vm1, %v231_v13, %v233_v18 }
  0xb6   : > { %v255_v25 = vsub.f32 0.0, %v227_v23  ;;  %v254_v29 = vsub.f32 0.0, %v228_v24 }
  0xb8   : > { %v237_v30 = vpop.permute.xlu1 %236  ;;  %v235_v31 = vpop.permute.xlu0 %234  ;;  %v259_v32 = vsel %vm1053_vm2, %v255_v25, %v241_v26 }
  0xb9   : > { %v242_v33 = vsel %vm238_vm1, %v237_v30, %v231_v13  ;;  %v239_v34 = vsel %vm238_vm1, %v235_v31, %v237_v30  ;;  %v240_v35 = vsel %vm238_vm1, %v233_v18, %v235_v31  ;;  %691 = vmatprep.subr.msk.mxu0 %vm268_vm3, %v259_v32 }
  0xba   : > { %v258_v37 = vsel %vm250_vm4, %v254_v29, %v242_v33  ;;  %v261_v38 = vsel %vm253_vm5, %v257_v28, %v239_v34  ;;  %v260_v39 = vsel %vm252_vm6, %v256_v27, %v240_v35 }
  0xbb   : > { %692 = vmatpush1.msk.msra.mxu0 %vm268_vm3, %v258_v37  ;;  %694 = vmatprep.subr.msk.mxu1 %vm268_vm3, %v261_v38 }
  0xbc   : > { %693 = vmatmul.mubr.msk.f32.vlgmr.msra.gmra.mrb[0].mxu0 %vm264_vm7, %v263_v36  ;;  %695 = vmatpush1.msk.msra.mxu1 %vm268_vm3, %v260_v39 }
  0xbd   : > { %696 = vmatmul.mubr.msk.f32.vlgmr.msra.gmra.mrb[0].mxu1 %vm264_vm7, %v263_v36  ;;  %697 = vmatprep.subr.msk.mxu0 %vm268_vm3, %v211_v4 }
  0xbe   : > { %700 = vmatprep.subr.msk.mxu1 %vm268_vm3, %v212_v2  ;;  %698 = vmatpush1.msk.msra.mxu0 %vm268_vm3, %v1041_v1 }
  0xbf   : > { %701 = vmatpush1.msk.msra.mxu1 %vm268_vm3, %v1039_v0  ;;  %498 = vmatprep.mubr.f32.mxu0 %v897_v3 }
  0xc0   : > { %569 = vmatprep.mubr.f32.mxu1 %v897_v3 }
  0xc4   : > { %699 = vmatmul.mubr.msk.f32.vlgmr.msra.gmra.mrb[0].mxu0 %vm264_vm7, %v262_v40 }
  0xc5   : > { %702 = vmatmul.mubr.msk.f32.vlgmr.msra.gmra.mrb[0].mxu1 %vm264_vm7, %v262_v40 }
 0x197   : > { %v500_v41 = vpop.f32.mrb[0].mxu0 }
 0x198   : > { %576 = vst [vmem:[%s204_s22] sm:$0xff] %v500_v41  ;;  %v502_v42 = vpop.f32.mrb[1].mxu0  ;;  %v571_v43 = vpop.f32.mrb[0].mxu1 }
 0x199   : > { %577 = vst [vmem:[%s204_s22 + $0x8] sm:$0xff] %v502_v42  ;;  %578 = vst [vmem:[%s204_s22 + $0x10] sm:$0xff] %v571_v43  ;;  %v573_v44 = vpop.f32.mrb[1].mxu1 }
 0x19a   : > { %579 = vst [vmem:[%s204_s22 + $0x18] sm:$0xff] %v573_v44 }
 0x19b   : > { %824 = shalt.err (!%p821_p6)
}
 0x19c   : > { %s825_s5 = scalar_lea.hbm %s1092_s4, 512  ;;  %s829_s9 = scalar_lea.hbm %s1142_s3, 1024 }
 0x19d   : > { %p826_p4 = scmp.ne.s32.totalorder %s1092_s4, %s825_s5  ;;  %p830_p1 = scmp.lt.u32.totalorder %s1092_s4, %s1142_s3 }
 0x19e   : > { %p831_p2 = scmp.lt.u32.totalorder %s829_s9, %s825_s5  ;;  %p833_p8 = scmp.lt.u32.totalorder %s825_s5, %s1092_s4 }
 0x19f   : > { %p827_p10 = pnand %p826_p4, %p1153_p9 }
 0x1a0   : > { %p832_p5 = por %p831_p2, %p830_p1 }
 0x1a1   : > { %p828_p12 = pneg %p827_p10 }
 0x1a2   : > { %p834_p11 = por %p833_p8, %p832_p5 }
 0x1a4   : > { %p835_p0 = pnand %p834_p11, %p828_p12 }
 0x1a6   : > { %838 = shalt.err (!%p835_p0)
}
 0x1a7   : > { %716 = dma.vmem_to_hbm [thread:$0]  (%p1153_p9), %s1087_s23, 512, %s1092_s4, %s581_s7  }
 0x1a8 PF: > { %s609_s21 = sand.u32 1, %s873_s12   ;;  %p1154_p7 = scmp.ne.s32.totalorder %s1147_s27, 0 }
 0x1a9   : > { %p1155_p13 = scmp.ge.s32.totalorder %s893_s17, 2  ;;  %s610_s22 = scalar_lea.sflag [#allocation4], %s609_s21 }
 0x1ab   : > { %p723_p3 = pnand %p1155_p13, %p1154_p7 }
 0x1ad   : > { %868 = dma.done.wait (!%p723_p3), %s610_s22, 512  }
 0x1ae   : > { %870 = vsyncadd (!%p723_p3), %s610_s22, 4294966784  ;;  %s19_s17 = sadd.s32 1, %s893_s17   ;;  %s1156_s12 = smov %s877_s13 }
 0x1af   : > { %p16_p6 = scmp.ge.s32.totalorder %s19_s17, 4   ;;  %s1157_s13 = smov %s881_s14 }
 0x1b0   : > { %s1158_s14 = smov %s976_s26  ;;  %s1159_s15 = smov %s889_s16 }
 0x1b1   : > { %s1160_s16 = smov %s1162_s20  ;;  %18 = sbr.rel (!%p16_p6) target bundleno = 6 (0x6), region = 77 }
 0x1b8   :  { %615 = vsyncpa [#allocation3], 1 }
 0x1b9   :  { %617 = vsyncpa [#allocation3 + $0x1], 1 }
 0x1ba   :  { %618 = vsyncpa [#allocation4], 1 }
 0x1bb   :  { %620 = vsyncpa [#allocation4 + $0x1], 1 }

</bundles_post_ra>
